<compile_context>
chip_gen: v5e
topology: v5e:2x2
jax: 0.10.0
libtpu: 0.0.40
codegen_flags: <defaults>
</compile_context>

<pallas_src>
import jax
import jax.numpy as jnp
import numpy as np
from jax.experimental import pallas as pl
from jax.experimental.pallas import tpu as pltpu

INPUT_SIZE = 4
HIDDEN_SIZE = 32
OUTPUT_SIZE = 8
LANE = 128          # one f32 vreg lane width; every packed segment is one vreg wide
N_SEG = 5           # lanes 0:256 fused first push | 256:384 wc_a | 384:512 w_ih | 512:640 wo
BIAS_ROW = 40       # bias stash row: activation lane 40 is always 0, so this row never
                    # enters any matmul; it is read directly for exact f32 bias adds


def decoder_kernel(act_ref, enc_ref, w_ref, out_ref):
    H, O = HIDDEN_SIZE, OUTPUT_SIZE

    act = act_ref[...]                                    # (1, 128): [h_in | x | 0-pad]
    h = act[:, 0:H]                                       # lane-aligned h_in

    # Biases (exact f32), read from the stash row of the packed weight slab.
    b0 = w_ref[BIAS_ROW:BIAS_ROW + 1, 0:2 * LANE]         # [b_hh | ba | bc | 0]   (1, 256)
    bih = w_ref[BIAS_ROW:BIAS_ROW + 1, 3 * LANE:4 * LANE] # [b_ih | 0]             (1, 128)
    bo = w_ref[BIAS_ROW:BIAS_ROW + 1, 4 * LANE:5 * LANE]  # [bo   | 0]             (1, 128)

    # ---- fused first MXU push: one (1,128)@(128,256) matmul -------------------------
    res0 = jnp.dot(act, w_ref[:, 0:2 * LANE],
                   preferred_element_type=jnp.float32) + b0                        # (1, 256)
    # lanes 0:96 = gh, 96:128 = attention logits, 128:160 = x@wc_x + bc, 160:256 = 0

    # attention_weights = softmax(attention(cat([x, h_in], dim=1)), dim=1)
    a_logits = res0[:, 3 * H:4 * H]
    a_shift = a_logits - jnp.max(a_logits, axis=1, keepdims=True)
    a_exp = jnp.exp(a_shift)
    attn = a_exp / jnp.sum(a_exp, axis=1, keepdims=True)                            # (1, H)

    # attention_applied = bmm(attn.unsqueeze(0), enc.unsqueeze(0))[0] = attn @ enc
    applied = jnp.dot(attn, enc_ref[...], preferred_element_type=jnp.float32)       # (1, H)

    # relu(attention_combine(cat([x, attention_applied], dim=1)))
    cres = jnp.dot(applied, w_ref[0:H, 2 * LANE:3 * LANE],
                   preferred_element_type=jnp.float32)                              # (1, 128)
    g128 = jnp.maximum(res0[:, LANE:2 * LANE] + cres, 0.0)                          # (1, 128)
    g = g128[:, 0:H]                                                                # (1, H)

    # GRUCell step (PyTorch gate order r, z, n); gi/gh lane layouts are identical,
    # so their combination is one full-vreg add and one 64-lane sigmoid.
    gi = jnp.dot(g, w_ref[0:H, 3 * LANE:4 * LANE],
                 preferred_element_type=jnp.float32) + bih                          # (1, 128)
    gh = res0[:, 0:LANE]                                                            # lanes 0:96 valid
    s = gi + gh
    rz = jax.nn.sigmoid(s[:, 0:2 * H])                                              # r | z
    r = rz[:, 0:H]
    z = rz[:, H:2 * H]
    n = jnp.tanh(gi[:, 2 * H:3 * H] + r * gh[:, 2 * H:3 * H])
    h_new = (1.0 - z) * n + z * h                                                   # (1, H)

    # log_softmax(out(h_new), dim=1)
    ologit = jnp.dot(h_new, w_ref[0:H, 4 * LANE:5 * LANE],
                     preferred_element_type=jnp.float32) + bo                       # (1, 128)
    o = ologit[:, 0:O]
    o_shift = o - jnp.max(o, axis=1, keepdims=True)
    logp = o_shift - jnp.log(jnp.sum(jnp.exp(o_shift), axis=1, keepdims=True))      # (1, O)

    # Single lane-dense, unmasked store: [logp | h_out | attn | 0-pad] -> one DMA out.
    pad = jnp.zeros((1, LANE - O - 2 * H), jnp.float32)
    out_ref[...] = jnp.concatenate([logp, h_new, attn, pad], axis=1)


def pack_params(p):
    """Pack the 12 weight/bias arrays into ONE lane-dense (128, 640) slab (done once)."""
    H, I, O = HIDDEN_SIZE, INPUT_SIZE, OUTPUT_SIZE
    w = jnp.zeros((LANE, N_SEG * LANE), jnp.float32)

    # -- lanes 0:256: fused first push  [gh | attention logits | x@wc_x | 0] --
    w = w.at[0:H, 0:3 * H].set(p['w_hh'])                      # h rows -> GRU hidden gates
    w = w.at[0:H, 3 * H:4 * H].set(p['wa_h'])                  # h rows -> attention logits
    w = w.at[H:H + I, 3 * H:4 * H].set(p['wa_x'])              # x rows -> attention logits
    w = w.at[H:H + I, LANE:LANE + H].set(p['wc_x'])            # x rows -> combine (x part)
    # -- lanes 256:384: wc_a (combine, attention-applied part) --
    w = w.at[0:H, 2 * LANE:2 * LANE + H].set(p['wc_a'])
    # -- lanes 384:512: GRU w_ih (same gate-lane layout as w_hh above) --
    w = w.at[0:H, 3 * LANE:3 * LANE + 3 * H].set(p['w_ih'])
    # -- lanes 512:640: output projection --
    w = w.at[0:H, 4 * LANE:4 * LANE + O].set(p['wo'])
    # -- bias stash row (never activated by any matmul; read + added in f32) --
    w = w.at[BIAS_ROW, 0:3 * H].set(p['b_hh'][0])
    w = w.at[BIAS_ROW, 3 * H:4 * H].set(p['ba'][0])
    w = w.at[BIAS_ROW, LANE:LANE + H].set(p['bc'][0])
    w = w.at[BIAS_ROW, 3 * LANE:3 * LANE + 3 * H].set(p['b_ih'][0])
    w = w.at[BIAS_ROW, 4 * LANE:4 * LANE + O].set(p['bo'][0])
    return w


@jax.jit
def decoder_forward(x, h_in, encoder_outputs, w_big):
    H, I, O = HIDDEN_SIZE, INPUT_SIZE, OUTPUT_SIZE
    # One lane-dense activation buffer: [h_in | x | 0-pad]  (x.unsqueeze(0) is implicit).
    act = jnp.zeros((1, LANE), jnp.float32)
    act = act.at[:, 0:H].set(h_in.astype(jnp.float32))
    act = act.at[:, H:H + I].set(x.reshape(1, -1).astype(jnp.float32))

    vmem = lambda: pl.BlockSpec(memory_space=pltpu.MemorySpace.VMEM)
    out = pl.pallas_call(
        decoder_kernel,
        out_shape=jax.ShapeDtypeStruct((1, LANE), jnp.float32),
        in_specs=[vmem(), vmem(), vmem()],
        out_specs=vmem(),
    )(act, encoder_outputs.astype(jnp.float32), w_big)

    logp = out[:, 0:O]
    h_out = out[:, O:O + H]
    attn = out[:, O + H:O + 2 * H]
    return logp, h_out, attn
    # TODO(synk): for v7x, a batch dimension would be sharded across the two
    # TensorCores via a leading "parallel" grid axis; this module has batch=1.


def init_params(key):
    H, I, O = HIDDEN_SIZE, INPUT_SIZE, OUTPUT_SIZE
    ks = jax.random.split(key, 10)

    def unif(k, shape, bound):
        return jax.random.uniform(k, shape, jnp.float32, -bound, bound)

    k_lin = 1.0 / np.sqrt(I + H)
    wa = unif(ks[0], (H, I + H), k_lin)       # PyTorch (out, in)
    ba = unif(ks[1], (1, H), k_lin)
    wc = unif(ks[2], (H, I + H), k_lin)
    bc = unif(ks[3], (1, H), k_lin)
    k_rnn = 1.0 / np.sqrt(H)
    w_ih = unif(ks[4], (3 * H, H), k_rnn)
    w_hh = unif(ks[5], (3 * H, H), k_rnn)
    b_ih = unif(ks[6], (1, 3 * H), k_rnn)
    b_hh = unif(ks[7], (1, 3 * H), k_rnn)
    wo = unif(ks[8], (O, H), k_rnn)
    bo = unif(ks[9], (1, O), k_rnn)
    return dict(
        wa_x=wa[:, :I].T, wa_h=wa[:, I:].T, ba=ba,
        wc_x=wc[:, :I].T, wc_a=wc[:, I:].T, bc=bc,
        w_ih=w_ih.T, w_hh=w_hh.T, b_ih=b_ih, b_hh=b_hh,
        wo=wo.T, bo=bo,
    )


def reference(x, h_in, enc, p):
    H = HIDDEN_SIZE
    x2 = x.reshape(1, -1)
    attn = jax.nn.softmax(x2 @ p['wa_x'] + h_in @ p['wa_h'] + p['ba'], axis=1)
    applied = attn @ enc
    g = jax.nn.relu(x2 @ p['wc_x'] + applied @ p['wc_a'] + p['bc'])
    gi = g @ p['w_ih'] + p['b_ih']
    gh = h_in @ p['w_hh'] + p['b_hh']
    r = jax.nn.sigmoid(gi[:, :H] + gh[:, :H])
    z = jax.nn.sigmoid(gi[:, H:2 * H] + gh[:, H:2 * H])
    n = jnp.tanh(gi[:, 2 * H:] + r * gh[:, 2 * H:])
    h_out = (1.0 - z) * n + z * h_in
    logp = jax.nn.log_softmax(h_out @ p['wo'] + p['bo'], axis=1)
    return logp, h_out, attn


if __name__ == "__main__":
    key = jax.random.PRNGKey(0)
    k_x, k_h, k_e, k_p = jax.random.split(key, 4)

    x = jax.random.normal(k_x, (INPUT_SIZE,), jnp.float32)                      # (I,)
    h_in = jax.random.normal(k_h, (1, HIDDEN_SIZE), jnp.float32)                # (1, H)
    encoder_outputs = jax.random.normal(k_e, (HIDDEN_SIZE, HIDDEN_SIZE),
                                        jnp.float32)                           # (H, H)
    params = init_params(k_p)
    w_big = pack_params(params)                                                 # one-time weight packing

    logp, h_out, attn = decoder_forward(x, h_in, encoder_outputs, w_big)
    jax.block_until_ready((logp, h_out, attn))

    ref_logp, ref_h, ref_attn = reference(x, h_in, encoder_outputs, params)
    np.testing.assert_allclose(np.asarray(logp), np.asarray(ref_logp), rtol=1e-5, atol=1e-5)
    np.testing.assert_allclose(np.asarray(h_out), np.asarray(ref_h), rtol=1e-5, atol=1e-5)
    np.testing.assert_allclose(np.asarray(attn), np.asarray(ref_attn), rtol=1e-5, atol=1e-5)

    print("KERNEL_OK")
</pallas_src>

<mosaic_0001>
module attributes {stable_mosaic.version = 11 : i64} {
  func.func @decoder_kernel(%arg0: memref<1x128xf32, #tpu.memory_space<vmem>>, %arg1: memref<32x32xf32, #tpu.memory_space<vmem>>, %arg2: memref<128x640xf32, #tpu.memory_space<vmem>>, %arg3: memref<1x128xf32, #tpu.memory_space<vmem>>) attributes {dimension_semantics = [], scalar_prefetch = 0 : i64, scratch_operands = 0 : i64, tpu.core_type = #tpu.core_type<tc>} {
    %c0 = arith.constant 0 : index
    %c0_0 = arith.constant 0 : index
    %0 = vector.load %arg0[%c0, %c0_0] : memref<1x128xf32, #tpu.memory_space<vmem>>, vector<1x128xf32>
    %1 = vector.extract_strided_slice %0 {offsets = [0, 0], sizes = [1, 32], strides = [1, 1]} : vector<1x128xf32> to vector<1x32xf32>
    %c40 = arith.constant 40 : index
    %c0_1 = arith.constant 0 : index
    %2 = vector.load %arg2[%c40, %c0_1] : memref<128x640xf32, #tpu.memory_space<vmem>>, vector<1x256xf32>
    %c40_2 = arith.constant 40 : index
    %c384 = arith.constant 384 : index
    %3 = vector.load %arg2[%c40_2, %c384] : memref<128x640xf32, #tpu.memory_space<vmem>>, vector<1x128xf32>
    %c40_3 = arith.constant 40 : index
    %c512 = arith.constant 512 : index
    %4 = vector.load %arg2[%c40_3, %c512] : memref<128x640xf32, #tpu.memory_space<vmem>>, vector<1x128xf32>
    %c0_4 = arith.constant 0 : index
    %c0_5 = arith.constant 0 : index
    %5 = vector.load %arg2[%c0_4, %c0_5] : memref<128x640xf32, #tpu.memory_space<vmem>>, vector<128x256xf32>
    %cst = arith.constant dense<0.000000e+00> : vector<1x256xf32>
    %6 = tpu.matmul %0, %5, %cst {dimension_numbers = #tpu.dot_dimension_numbers<[1], [0], [0], [1], [0, 0, 1, 1], [], []>} : vector<1x128xf32>, vector<128x256xf32>, vector<1x256xf32> -> vector<1x256xf32>
    %7 = arith.addf %6, %2 : vector<1x256xf32>
    %8 = vector.extract_strided_slice %7 {offsets = [0, 96], sizes = [1, 32], strides = [1, 1]} : vector<1x256xf32> to vector<1x32xf32>
    %cst_6 = arith.constant dense<0xFF800000> : vector<1xf32>
    %9 = vector.multi_reduction <maximumf>, %8, %cst_6 [1] : vector<1x32xf32> to vector<1xf32>
    %10 = vector.shape_cast %9 : vector<1xf32> to vector<1x1xf32>
    %11 = vector.broadcast %10 : vector<1x1xf32> to vector<1x32xf32>
    %12 = arith.subf %8, %11 : vector<1x32xf32>
    %13 = math.exp %12 : vector<1x32xf32>
    %cst_7 = arith.constant dense<0.000000e+00> : vector<1xf32>
    %14 = vector.multi_reduction <add>, %13, %cst_7 [1] : vector<1x32xf32> to vector<1xf32>
    %15 = vector.shape_cast %14 : vector<1xf32> to vector<1x1xf32>
    %16 = vector.broadcast %15 : vector<1x1xf32> to vector<1x32xf32>
    %17 = arith.divf %13, %16 : vector<1x32xf32>
    %c0_8 = arith.constant 0 : index
    %c0_9 = arith.constant 0 : index
    %18 = vector.load %arg1[%c0_8, %c0_9] : memref<32x32xf32, #tpu.memory_space<vmem>>, vector<32x32xf32>
    %cst_10 = arith.constant dense<0.000000e+00> : vector<1x32xf32>
    %19 = tpu.matmul %17, %18, %cst_10 {dimension_numbers = #tpu.dot_dimension_numbers<[1], [0], [0], [1], [0, 0, 1, 1], [], []>} : vector<1x32xf32>, vector<32x32xf32>, vector<1x32xf32> -> vector<1x32xf32>
    %c0_11 = arith.constant 0 : index
    %c256 = arith.constant 256 : index
    %20 = vector.load %arg2[%c0_11, %c256] : memref<128x640xf32, #tpu.memory_space<vmem>>, vector<32x128xf32>
    %cst_12 = arith.constant dense<0.000000e+00> : vector<1x128xf32>
    %21 = tpu.matmul %19, %20, %cst_12 {dimension_numbers = #tpu.dot_dimension_numbers<[1], [0], [0], [1], [0, 0, 1, 1], [], []>} : vector<1x32xf32>, vector<32x128xf32>, vector<1x128xf32> -> vector<1x128xf32>
    %22 = vector.extract_strided_slice %7 {offsets = [0, 128], sizes = [1, 128], strides = [1, 1]} : vector<1x256xf32> to vector<1x128xf32>
    %23 = arith.addf %22, %21 : vector<1x128xf32>
    %cst_13 = arith.constant 0.000000e+00 : f32
    %24 = vector.broadcast %cst_13 : f32 to vector<1x128xf32>
    %25 = arith.maximumf %23, %24 : vector<1x128xf32>
    %26 = vector.extract_strided_slice %25 {offsets = [0, 0], sizes = [1, 32], strides = [1, 1]} : vector<1x128xf32> to vector<1x32xf32>
    %c0_14 = arith.constant 0 : index
    %c384_15 = arith.constant 384 : index
    %27 = vector.load %arg2[%c0_14, %c384_15] : memref<128x640xf32, #tpu.memory_space<vmem>>, vector<32x128xf32>
    %cst_16 = arith.constant dense<0.000000e+00> : vector<1x128xf32>
    %28 = tpu.matmul %26, %27, %cst_16 {dimension_numbers = #tpu.dot_dimension_numbers<[1], [0], [0], [1], [0, 0, 1, 1], [], []>} : vector<1x32xf32>, vector<32x128xf32>, vector<1x128xf32> -> vector<1x128xf32>
    %29 = arith.addf %28, %3 : vector<1x128xf32>
    %30 = vector.extract_strided_slice %7 {offsets = [0, 0], sizes = [1, 128], strides = [1, 1]} : vector<1x256xf32> to vector<1x128xf32>
    %31 = arith.addf %29, %30 : vector<1x128xf32>
    %32 = vector.extract_strided_slice %31 {offsets = [0, 0], sizes = [1, 64], strides = [1, 1]} : vector<1x128xf32> to vector<1x64xf32>
    %33 = arith.negf %32 : vector<1x64xf32>
    %34 = math.exp %33 : vector<1x64xf32>
    %cst_17 = arith.constant 1.000000e+00 : f32
    %35 = vector.broadcast %cst_17 : f32 to vector<1x64xf32>
    %36 = arith.addf %35, %34 : vector<1x64xf32>
    %37 = arith.divf %35, %36 : vector<1x64xf32>
    %38 = vector.extract_strided_slice %37 {offsets = [0, 0], sizes = [1, 32], strides = [1, 1]} : vector<1x64xf32> to vector<1x32xf32>
    %39 = vector.extract_strided_slice %37 {offsets = [0, 32], sizes = [1, 32], strides = [1, 1]} : vector<1x64xf32> to vector<1x32xf32>
    %40 = vector.extract_strided_slice %29 {offsets = [0, 64], sizes = [1, 32], strides = [1, 1]} : vector<1x128xf32> to vector<1x32xf32>
    %41 = vector.extract_strided_slice %30 {offsets = [0, 64], sizes = [1, 32], strides = [1, 1]} : vector<1x128xf32> to vector<1x32xf32>
    %42 = arith.mulf %38, %41 : vector<1x32xf32>
    %43 = arith.addf %40, %42 : vector<1x32xf32>
    %44 = math.tanh %43 : vector<1x32xf32>
    %cst_18 = arith.constant 1.000000e+00 : f32
    %45 = vector.broadcast %cst_18 : f32 to vector<1x32xf32>
    %46 = arith.subf %45, %39 : vector<1x32xf32>
    %47 = arith.mulf %46, %44 : vector<1x32xf32>
    %48 = arith.mulf %39, %1 : vector<1x32xf32>
    %49 = arith.addf %47, %48 : vector<1x32xf32>
    %c0_19 = arith.constant 0 : index
    %c512_20 = arith.constant 512 : index
    %50 = vector.load %arg2[%c0_19, %c512_20] : memref<128x640xf32, #tpu.memory_space<vmem>>, vector<32x128xf32>
    %cst_21 = arith.constant dense<0.000000e+00> : vector<1x128xf32>
    %51 = tpu.matmul %49, %50, %cst_21 {dimension_numbers = #tpu.dot_dimension_numbers<[1], [0], [0], [1], [0, 0, 1, 1], [], []>} : vector<1x32xf32>, vector<32x128xf32>, vector<1x128xf32> -> vector<1x128xf32>
    %52 = arith.addf %51, %4 : vector<1x128xf32>
    %53 = vector.extract_strided_slice %52 {offsets = [0, 0], sizes = [1, 8], strides = [1, 1]} : vector<1x128xf32> to vector<1x8xf32>
    %cst_22 = arith.constant dense<0xFF800000> : vector<1xf32>
    %54 = vector.multi_reduction <maximumf>, %53, %cst_22 [1] : vector<1x8xf32> to vector<1xf32>
    %55 = vector.shape_cast %54 : vector<1xf32> to vector<1x1xf32>
    %56 = vector.broadcast %55 : vector<1x1xf32> to vector<1x8xf32>
    %57 = arith.subf %53, %56 : vector<1x8xf32>
    %58 = math.exp %57 : vector<1x8xf32>
    %cst_23 = arith.constant dense<0.000000e+00> : vector<1xf32>
    %59 = vector.multi_reduction <add>, %58, %cst_23 [1] : vector<1x8xf32> to vector<1xf32>
    %60 = vector.shape_cast %59 : vector<1xf32> to vector<1x1xf32>
    %61 = math.log %60 : vector<1x1xf32>
    %62 = vector.broadcast %61 : vector<1x1xf32> to vector<1x8xf32>
    %63 = arith.subf %57, %62 : vector<1x8xf32>
    %cst_24 = arith.constant 0.000000e+00 : f32
    %64 = vector.broadcast %cst_24 : f32 to vector<1x56xf32>
    %65 = tpu.concatenate %63, %49, %17, %64 in 1 : vector<1x8xf32>, vector<1x32xf32>, vector<1x32xf32>, vector<1x56xf32> -> vector<1x128xf32>
    %c0_25 = arith.constant 0 : index
    %c0_26 = arith.constant 0 : index
    %66 = vector.load %arg3[%c0_25, %c0_26] : memref<1x128xf32, #tpu.memory_space<vmem>>, vector<1x128xf32>
    tpu.vector_store %arg3[%c0_25, %c0_26], %65 {strides = array<i32>} : memref<1x128xf32, #tpu.memory_space<vmem>>, vector<1x128xf32>,
    return
  }
}

</mosaic_0001>

<bundles_post_ra>
// kernel: decoder_forward.1
= control target key start
LH: loop header
LB: loop body
LE: loop exit
PB: predicated region body
PF: predicated region fallthrough
CT: control target
= control target key end

     0   :  { %8 = vsyncpa [#allocation3], 0  ;;  %s505_s0 = inlined_call_operand.vmem [shape: f32[1,128], index: 0, kind: input, shape index: {}]   ;;  %s506_s1 = inlined_call_operand.hbm [shape: f32[32,32], index: 1, kind: input, shape index: {}]   ;;  %s507_s2 = inlined_call_operand.hbm [shape: f32[128,640], index: 2, kind: input, shape index: {}]   ;;  %s508_s3 = inlined_call_operand.vmem [shape: f32[1,128], index: 3, kind: output, shape index: {}]  }
   0x1   :  { %s16_s14 = sshll.u32 %s506_s1, 4  ;;  %s17_s14 = int_to_ptr.hbm [resolvable:$true] %s16_s14 }
   0x2   :  { %9 = vsyncpa [#allocation5], 0  ;;  %s432_s15 = smov [#allocation2]   ;;  %s29_s19 = sshll.u32 %s507_s2, 4  ;;  %s30_s19 = int_to_ptr.hbm [resolvable:$true] %s29_s19 }
   0x3   :  { %s18_s16 = sshll.u32 %s432_s15, 4  ;;  %s433_s20 = smov 128   ;;  %s19_s16 = int_to_ptr.vmem [resolvable:$true] %s18_s16 }
   0x4   :  { %s434_s21 = smov 8   ;;  %s435_s22 = smov [#allocation4]  }
   0x5   :  { %24 = dma.hbm_to_vmem [thread:$0]  %s17_s14, 512, %s19_s16, [#allocation3], %s433_s20, %s433_s20, %s434_s21  }
   0x6   :  { %s31_s23 = sshll.u32 %s435_s22, 4  ;;  %s436_s24 = smov 640   ;;  %s32_s23 = int_to_ptr.vmem [resolvable:$true] %s31_s23 }
   0x7   :  { %s437_s25 = smov 40  }
   0x8   :  { %37 = dma.hbm_to_vmem [thread:$0]  %s30_s19, 10240, %s32_s23, [#allocation5], %s436_s24, %s436_s24, %s437_s25  }
   0x9   :  { %428 = dma.done.wait [#allocation3], 512  }
   0xa   :  { %429 = vsyncadd [#allocation3], 4294966784 }
   0xb   :  { %430 = dma.done.wait [#allocation5], 10240  }
   0xc   :  { %431 = vsyncadd [#allocation5], 4294957056  ;;  %v81_v0 = vld [vmem:[#allocation4 + $0x258] sm:$0xff]  ;;  %v79_v1 = vld [vmem:[#allocation4 + $0x230] sm:$0xff]  ;;  %vm128_vm0 = vcmask 1041152   ;;  %s438_s26 = smov 64  }
   0xd   :  { %88 = vmatpush.msra.mxu0 %v81_v0  ;;  %v77_v2 = vld [vmem:[#allocation4 + $0x208] sm:$0xff]  ;;  %v75_v3 = vld [vmem:[#allocation4 + $0x1e0] sm:$0xff]  ;;  %v73_v4 = vld [vmem:[#allocation4 + $0x1b8] sm:$0xff]  ;;  %s439_s27 = smov 32   ;;  %vm139_vm1 = vcmask 253952   ;;  %vm165_vm6 = vcmask 261120  }
   0xe   :  { %v71_v5 = vld [vmem:[#allocation4 + $0x190] sm:$0xff]  ;;  %v69_v6 = vld [vmem:[#allocation4 + $0x168] sm:$0xff]  ;;  %v67_v7 = vld [vmem:[#allocation4 + $0x140] sm:$0xff]  ;;  %s440_s28 = smov 96   ;;  %s441_s4 = smov 104   ;;  %vm317_vm11 = vcmask 57344  }
   0xf   :  { %89 = vmatpush.msra.mxu0 %v79_v1  ;;  %v65_v8 = vld [vmem:[#allocation4 + $0x118] sm:$0xff]  ;;  %v63_v9 = vld [vmem:[#allocation4 + $0xf0] sm:$0xff]  ;;  %v61_v10 = vld [vmem:[#allocation4 + $0xc8] sm:$0xff]  ;;  %vm336_vm12 = vcmask 64512   ;;  %vm338_vm13 = vcmask 326656   ;;  %vm340_vm14 = vcmask 588800  }
  0x10   :  { %v59_v11 = vld [vmem:[#allocation4 + $0xa0] sm:$0xff]  ;;  %v57_v12 = vld [vmem:[#allocation4 + $0x78] sm:$0xff]  ;;  %v55_v13 = vld [vmem:[#allocation4 + $0x50] sm:$0xff] }
  0x11   :  { %90 = vmatpush.msra.mxu0 %v77_v2  ;;  %v53_v14 = vld [vmem:[#allocation4 + $0x28] sm:$0xff]  ;;  %v51_v15 = vld [vmem:[#allocation4] sm:$0xff]  ;;  %v161_v28 = vld [vmem:[#allocation2 + $0x18] sm:$0xff] }
  0x12   :  { %v472_v16 = vld [vmem:[%s505_s0] sm:$0x1]  ;;  %v475_v17 = vld [vmem:[#allocation4 + $0xc8] ss:$8 sm:$0x3]  ;;  %180 = vmatpush.msra.mxu2 %v161_v28  ;;  %v80_v45 = vld [vmem:[#allocation4 + $0x238] sm:$0xff] }
  0x13   :  { %91 = vmatpush.msra.mxu0 %v75_v3  ;;  %v84_v18 = vperm.slane %v475_v17, 0  ;;  %v160_v29 = vld [vmem:[#allocation2 + $0x10] sm:$0xff]  ;;  %v159_v30 = vld [vmem:[#allocation2 + $0x8] sm:$0xff]  ;;  %v158_v31 = vld [vmem:[#allocation2] sm:$0xff] }
  0x14   :  { %181 = vmatpush.msra.mxu2 %v160_v29  ;;  %v82_v44 = vld [vmem:[#allocation4 + $0x260] sm:$0xff]  ;;  %v78_v46 = vld [vmem:[#allocation4 + $0x210] sm:$0xff]  ;;  %v191_v47 = vld [vmem:[#allocation4 + $0x88] sm:$0xff] }
  0x15   :  { %92 = vmatpush.msra.mxu0 %v73_v4  ;;  %108 = vmatpush.msra.mxu1 %v82_v44  ;;  %v76_v48 = vld [vmem:[#allocation4 + $0x1e8] sm:$0xff]  ;;  %v190_v49 = vld [vmem:[#allocation4 + $0x60] sm:$0xff]  ;;  %v189_v50 = vld [vmem:[#allocation4 + $0x38] sm:$0xff] }
  0x16   :  { %182 = vmatpush.msra.mxu2 %v159_v30  ;;  %207 = vmatpush.msra.mxu3 %v191_v47  ;;  %v74_v51 = vld [vmem:[#allocation4 + $0x1c0] sm:$0xff]  ;;  %v72_v52 = vld [vmem:[#allocation4 + $0x198] sm:$0xff]  ;;  %v70_v53 = vld [vmem:[#allocation4 + $0x170] sm:$0xff] }
  0x17   :  { %93 = vmatpush.msra.mxu0 %v71_v5  ;;  %109 = vmatpush.msra.mxu1 %v80_v45  ;;  %v68_v54 = vld [vmem:[#allocation4 + $0x148] sm:$0xff]  ;;  %v66_v55 = vld [vmem:[#allocation4 + $0x120] sm:$0xff]  ;;  %v64_v56 = vld [vmem:[#allocation4 + $0xf8] sm:$0xff] }
  0x18   :  { %183 = vmatpush.msra.mxu2 %v158_v31  ;;  %208 = vmatpush.msra.mxu3 %v190_v49  ;;  %v62_v57 = vld [vmem:[#allocation4 + $0xd0] sm:$0xff]  ;;  %v60_v58 = vld [vmem:[#allocation4 + $0xa8] sm:$0xff]  ;;  %v58_v59 = vld [vmem:[#allocation4 + $0x80] sm:$0xff] }
  0x19   :  { %94 = vmatpush.msra.mxu0 %v69_v6  ;;  %110 = vmatpush.msra.mxu1 %v78_v46  ;;  %v56_v60 = vld [vmem:[#allocation4 + $0x58] sm:$0xff]  ;;  %v188_v62 = vld [vmem:[#allocation4 + $0x10] sm:$0xff]  ;;  %v52_v0 = vld [vmem:[#allocation4 + $0x8] sm:$0xff]  ;;  %v85_v6 = vperm.slane %v475_v17, 1 }
  0x1a   :  { %209 = vmatpush.msra.mxu3 %v189_v50  ;;  %v54_v63 = vld [vmem:[#allocation4 + $0x30] sm:$0xff]  ;;  %v219_v3 = vld [vmem:[#allocation4 + $0x68] sm:$0xff]  ;;  %v218_v4 = vld [vmem:[#allocation4 + $0x40] sm:$0xff] }
  0x1b   :  { %95 = vmatpush.msra.mxu0 %v67_v7  ;;  %111 = vmatpush.msra.mxu1 %v76_v48  ;;  %v220_v1 = vld [vmem:[#allocation4 + $0x90] sm:$0xff]  ;;  %v217_v5 = vld [vmem:[#allocation4 + $0x18] sm:$0xff]  ;;  %v50_v47 = vld [vmem:[#allocation4 + $0xe8] ss:$0 sm:$0xff] }
  0x1c   :  { %210 = vmatpush.msra.mxu3 %v188_v62  ;;  %236 = vmatpush.msrb.mxu2 %v220_v1 }
  0x1d   :  { %96 = vmatpush.msra.mxu0 %v65_v8  ;;  %112 = vmatpush.msra.mxu1 %v74_v51 }
  0x1e   :  { %237 = vmatpush.msrb.mxu2 %v219_v3 }
  0x1f   :  { %97 = vmatpush.msra.mxu0 %v63_v9  ;;  %113 = vmatpush.msra.mxu1 %v72_v52 }
  0x20   :  { %238 = vmatpush.msrb.mxu2 %v218_v4 }
  0x21   :  { %98 = vmatpush.msra.mxu0 %v61_v10  ;;  %114 = vmatpush.msra.mxu1 %v70_v53 }
  0x22   :  { %239 = vmatpush.msrb.mxu2 %v217_v5 }
  0x23   :  { %99 = vmatpush.msra.mxu0 %v59_v11  ;;  %115 = vmatpush.msra.mxu1 %v68_v54 }
  0x25   :  { %100 = vmatpush.msra.mxu0 %v57_v12  ;;  %116 = vmatpush.msra.mxu1 %v66_v55  ;;  %v49_v12 = vld [vmem:[#allocation4 + $0xe0] ss:$0 sm:$0xff] }
  0x27   :  { %101 = vmatpush.msra.mxu0 %v55_v13  ;;  %117 = vmatpush.msra.mxu1 %v64_v56 }
  0x29   :  { %102 = vmatpush.msra.mxu0 %v53_v14  ;;  %118 = vmatpush.msra.mxu1 %v62_v57 }
  0x2b   :  { %103 = vmatpush.msra.mxu0 %v51_v15  ;;  %119 = vmatpush.msra.mxu1 %v60_v58 }
  0x2c   :  { %104 = vmatmul.f32.vlgmr.msra.gmra.mxu0 %v472_v16 }
  0x2d   :  { %120 = vmatpush.msra.mxu1 %v58_v59 }
  0x2f   :  { %121 = vmatpush.msra.mxu1 %v56_v60 }
  0x31   :  { %122 = vmatpush.msra.mxu1 %v54_v63 }
  0x33   :  { %123 = vmatpush.msra.mxu1 %v52_v0 }
  0x34   :  { %124 = vmatmul.f32.vlgmr.msra.gmra.mxu1 %v472_v16 }
  0xa9   :  { %v105_v19 = vpop.f32.mrf.mxu0 }
  0xaa   :  { %v478_v20 = vadd.f32 %v105_v19, %v84_v18 }
  0xac   :  { %265 = vrot.lane.b32.xlu2 %v478_v20, %s438_s26  ;;  %v129_v21 = vsel %vm128_vm0, %v478_v20, -inf }
  0xad   :  { %130 = vmax.xlane.f32.xlu0 %v129_v21 }
  0xb1   :  { %v125_v7 = vpop.f32.mrf.mxu1 }
  0xb2   :  { %v126_v8 = vadd.f32 %v125_v7, %v85_v6 }
 0x106   :  { %v266_v29 = vpop.permute.xlu2 %265 }
 0x120   :  { %v131_v22 = vpop.xlane.xlu0 %130 }
 0x121   :  { %v132_v23 = vsub.f32 %v478_v20, %v131_v22 }
 0x123   :  { %v133_v24 = vmul.f32 1.442695, %v132_v23 }
 0x125   :  { %366 = vpow2.f32 %v133_v24 }
 0x12b   :  { %v367_v25 = vpop.eup %366 }
 0x12c   :  { %136 = vrot.lane.b32.xlu0 %v367_v25, %s439_s27 }
 0x19e   :  { %v137_v26 = vpop.permute.xlu0 %136 }
 0x19f   :  { %v140_v27 = vsel %vm139_vm1, %v137_v26, 0.0 }
 0x1a0   :  { %141 = vadd.xlane.f32.xlu1 %v140_v27 }
 0x213   :  { %v142_v32 = vpop.xlane.xlu1 %141 }
 0x214   :  { %368 = vrcp.f32 %v142_v32  ;;  %v154_v36 = vand.u32 2147483648, %v142_v32  ;;  %v152_v38 = vand.u32 2147483647, %v142_v32  ;;  %vm148_vm3 = vweird.f32 %v142_v32 }
 0x216   :  { %v155_v40 = vor.u32 1.1754944e-38, %v154_v36  ;;  %vm153_vm5 = vcmp.eq.f32.partialorder %v152_v38, 8.507059e+37  ;;  %v290_v36 = vld [vmem:[#allocation4 + $0x70] sm:$0xff] }
 0x21a   :  { %v369_v33 = vpop.eup %368 }
 0x21b   :  { %v144_v34 = vmul.f32 %v369_v33, %v142_v32  ;;  %vm149_vm2 = vweird.f32 %v369_v33 }
 0x21c   :  { %vm150_vm4 = vmor %vm148_vm3, %vm149_vm2 }
 0x21d   :  { %v145_v35 = vsub.f32 1.0, %v144_v34  ;;  %v365_v34 = vld [vmem:[%s505_s0] ss:$0 sm:$0xff]  ;;  %s442_s0 = smov 72  }
 0x21f   :  { %v146_v37 = vmul.f32 %v369_v33, %v145_v35  ;;  %v291_v35 = vld [vmem:[#allocation4 + $0x98] sm:$0xff] }
 0x220   :  { %309 = vmatpush.msrb.mxu3 %v291_v35 }
 0x221   :  { %v147_v39 = vadd.f32 %v369_v33, %v146_v37  ;;  %v289_v37 = vld [vmem:[#allocation4 + $0x48] sm:$0xff] }
 0x222   :  { %310 = vmatpush.msrb.mxu3 %v290_v36 }
 0x223   :  { %v151_v41 = vsel %vm150_vm4, %v369_v33, %v147_v39  ;;  %v288_v39 = vld [vmem:[#allocation4 + $0x20] sm:$0xff] }
 0x224   :  { %v156_v42 = vsel %vm153_vm5, %v155_v40, %v151_v41  ;;  %311 = vmatpush.msrb.mxu3 %v289_v37 }
 0x225   :  { %v485_v43 = vmul.f32 %v367_v25, %v156_v42 }
 0x226   :  { %312 = vmatpush.msrb.mxu3 %v288_v39 }
 0x227   :  { %163 = vrot.lane.b32.xlu1 %v485_v43, %s439_s27 }
 0x299   :  { %v164_v61 = vpop.permute.xlu1 %163 }
 0x29a   :  { %349 = vmatmul.msk.f32.vlgmr.msra.gmra.mxu2 %vm165_vm6, %v164_v61 }
 0x31d   :  { %v185_v2 = vpop.f32.mrf.mxu2 }
 0x31e   :  { %350 = vmatmul.msk.f32.vlgmr.msra.gmra.mxu3 %vm165_vm6, %v185_v2 }
 0x3a1   :  { %v212_v9 = vpop.f32.mrf.mxu3 }
 0x3a2   :  { %v215_v10 = vadd.f32 %v212_v9, %v126_v8 }
 0x3a4   :  { %v216_v11 = vmax.f32 %v215_v10, 0.0 }
 0x3a6   :  { %351 = vmatmul.msk.f32.vlgmr.msrb.gmra.mxu2 %vm165_vm6, %v216_v11 }
 0x429   :  { %v241_v13 = vpop.f32.mrf.mxu2 }
 0x42a   :  { %v242_v14 = vadd.f32 %v241_v13, %v49_v12 }
 0x42c   :  { %v244_v15 = vadd.f32 %v242_v14, %v478_v20 }
 0x42e   :  { %v352_v16 = vmul.f32 -1.442695, %v244_v15 }
 0x430   :  { %370 = vpow2.f32 %v352_v16 }
 0x436   :  { %v371_v18 = vpop.eup %370 }
 0x437   :  { %v248_v19 = vadd.f32 1.0, %v371_v18 }
 0x439   :  { %372 = vrcp.f32 %v248_v19  ;;  %v260_v23 = vand.u32 2147483648, %v248_v19  ;;  %v258_v25 = vand.u32 2147483647, %v248_v19  ;;  %vm254_vm8 = vweird.f32 %v248_v19 }
 0x43b   :  { %v261_v27 = vor.u32 1.1754944e-38, %v260_v23  ;;  %vm259_vm10 = vcmp.eq.f32.partialorder %v258_v25, 8.507059e+37 }
 0x43f   :  { %v373_v21 = vpop.eup %372 }
 0x440   :  { %v250_v22 = vmul.f32 %v373_v21, %v248_v19  ;;  %vm255_vm7 = vweird.f32 %v373_v21 }
 0x441   :  { %vm256_vm9 = vmor %vm254_vm8, %vm255_vm7 }
 0x442   :  { %v251_v17 = vsub.f32 1.0, %v250_v22 }
 0x444   :  { %v252_v24 = vmul.f32 %v373_v21, %v251_v17 }
 0x446   :  { %v253_v26 = vadd.f32 %v373_v21, %v252_v24 }
 0x448   :  { %v257_v28 = vsel %vm256_vm9, %v373_v21, %v253_v26 }
 0x449   :  { %v262_v20 = vsel %vm259_vm10, %v261_v27, %v257_v28 }
 0x44a   :  { %v268_v30 = vmul.f32 %v266_v29, %v262_v20  ;;  %v275_v40 = vsub.f32 1.0, %v262_v20 }
 0x44c   :  { %270 = vrot.lane.b32.xlu2 %v268_v30, %s438_s26 }
 0x4a6   :  { %v271_v31 = vpop.permute.xlu2 %270 }
 0x4a7   :  { %v273_v32 = vadd.f32 %v271_v31, %v242_v14 }
 0x4a9   :  { %374 = vtanh.f32 %v273_v32 }
 0x4af   :  { %v375_v33 = vpop.eup %374 }
 0x4b0   :  { %277 = vrot.lane.b32.xlu2 %v375_v33, %s440_s28 }
 0x4b8   :  { %283 = vrot.lane.b32.xlu2 %v365_v34, %s439_s27 }
 0x50a   :  { %v278_v38 = vpop.permute.xlu2 %277 }
 0x50b   :  { %v280_v42 = vmul.f32 %v278_v38, %v275_v40 }
 0x512   :  { %v284_v41 = vpop.permute.xlu2 %283 }
 0x513   :  { %v286_v44 = vmul.f32 %v284_v41, %v262_v20 }
 0x515   :  { %v287_v45 = vadd.f32 %v286_v44, %v280_v42 }
 0x517   :  { %293 = vrot.lane.b32.xlu0 %v287_v45, %s440_s28 }
 0x51f   :  { %330 = vrot.lane.b32.xlu0 %v287_v45, %s441_s4 }
 0x527   :  { %333 = vrot.lane.b32.xlu0 %v485_v43, %s442_s0 }
 0x589   :  { %v294_v46 = vpop.permute.xlu0 %293 }
 0x58a   :  { %353 = vmatmul.msk.f32.vlgmr.msrb.gmra.mxu3 %vm165_vm6, %v294_v46 }
 0x591   :  { %v331_v57 = vpop.permute.xlu0 %330 }
 0x599   :  { %v334_v60 = vpop.permute.xlu0 %333 }
 0x60d   :  { %v314_v48 = vpop.f32.mrf.mxu3 }
 0x60e   :  { %v315_v49 = vadd.f32 %v314_v48, %v50_v47 }
 0x610   :  { %v318_v50 = vsel %vm317_vm11, %v315_v49, -inf }
 0x611   :  { %319 = vmax.xlane.f32.xlu2 %v318_v50 }
 0x684   :  { %v320_v51 = vpop.xlane.xlu2 %319 }
 0x685   :  { %v321_v52 = vsub.f32 %v315_v49, %v320_v51 }
 0x687   :  { %v322_v53 = vmul.f32 1.442695, %v321_v52 }
 0x689   :  { %376 = vpow2.f32 %v322_v53 }
 0x68f   :  { %v377_v54 = vpop.eup %376 }
 0x690   :  { %v324_v55 = vsel %vm317_vm11, %v377_v54, 0.0 }
 0x691   :  { %325 = vadd.xlane.f32.xlu1 %v324_v55 }
 0x704   :  { %v326_v56 = vpop.xlane.xlu1 %325 }
 0x705   :  { %378 = vlog2.f32 %v326_v56 }
 0x70b   :  { %v379_v43 = vpop.eup %378 }
 0x70c   :  { %v328_v58 = vmul.f32 0.6931472, %v379_v43 }
 0x70e   :  { %v329_v59 = vsub.f32 %v321_v52, %v328_v58 }
 0x710   :  { %v337_v61 = vsel %vm336_vm12, %v329_v59, %v331_v57 }
 0x711   :  { %v339_v62 = vsel %vm338_vm13, %v337_v61, %v334_v60 }
 0x712   :  { %v341_v63 = vsel %vm340_vm14, %v339_v62, 0.0 }
 0x713   :  { %342 = vst [vmem:[%s508_s3] sm:$0x1] %v341_v63 }
 0x714   :  { %347 = vsyncpa [#allocation3], 1 }
 0x715   :  { %348 = vsyncpa [#allocation5], 1 }

</bundles_post_ra>
